<compile_context>
chip_gen: v7x
topology: tpu7x:2x2x1
jax: 0.10.0
libtpu: 0.0.40
codegen_flags: <defaults>
</compile_context>

<pallas_src>
import jax
import jax.numpy as jnp
from jax.experimental import pallas as pl
from jax.experimental.pallas import tpu as pltpu

G = 8  # samples interleaved per reshaped row (=> lane widths 24 / 128 / 64 / 16)


def _round_up(x, m):
    return (x + m - 1) // m * m


def _mlp_kernel(x_ref, a1_ref, b1_ref, a2_ref, b2_ref, a3_ref, b3_ref, o_ref):
    # x_ref: [R, 3G] tile; lane 3c+f = feature f of sample (row*G + c).
    x = x_ref[...]
    h = jnp.dot(x, a1_ref[...], preferred_element_type=jnp.float32)      # [R, 16G]
    h = jnp.maximum(h + b1_ref[...], 0.0)
    h = jnp.dot(h, a2_ref[...], preferred_element_type=jnp.float32)      # [R, 8G]
    h = jnp.maximum(h + b2_ref[...], 0.0)
    h = jnp.dot(h, a3_ref[...], preferred_element_type=jnp.float32)      # [R, 2G]
    o_ref[...] = (h + b3_ref[...]).astype(o_ref.dtype)                   # lane-dense store


def _expand_w(w):
    # nn.Linear weight [out, in] -> block-diagonal [G*in, G*out]:
    #   A[c*in + f, c*out + o] = w[o, f]   (kron block structure).
    return jnp.kron(jnp.eye(G, dtype=w.dtype), w.T)


def _expand_b(b):
    # bias [out, 1] (or [out]) -> [1, G*out], pattern repeated once per sample.
    return jnp.tile(jnp.reshape(b, (-1,)), G)[None, :]


def chargenet_forward(x, params, *, max_rows_per_step=8192):
    """x: [N, 3] float32.  params: W=[out,in], b=[out,1] (nn.Linear layout)."""
    n = x.shape[0]
    pad = (-n) % G
    if pad:  # rare: only when N is not a multiple of 8 (<= 7 padded rows)
        x = jnp.pad(x, ((0, pad), (0, 0)))
    n_pad = n + pad
    rows = n_pad // G
    xr = x.reshape(rows, 3 * G)              # free row-major reshape (lane-dense)

    a1, b1 = _expand_w(params["w1"]), _expand_b(params["b1"])   # [24,128], [1,128]
    a2, b2 = _expand_w(params["w2"]), _expand_b(params["b2"])   # [128,64], [1,64]
    a3, b3 = _expand_w(params["w3"]), _expand_b(params["b3"])   # [64,16],  [1,16]

    # Batch tile (in reshaped rows).  8192 rows = 65536 samples/step: amortizes
    # the ~0.35us per-step pipeline overhead on all generations while staying
    # ~30 MiB of VMEM.  Keep >= 2 grid steps when possible so the "parallel"
    # axis can actually split across v7x's two TensorCores.
    if rows <= 1024:
        rb = rows                            # single block == full array dims
    else:
        rb = min(max_rows_per_step, _round_up(pl.cdiv(rows, 2), 8))
    grid = (pl.cdiv(rows, rb),)              # ragged tail handled by Pallas

    resident = lambda arr: pl.BlockSpec(arr.shape, lambda i: (0, 0))

    out_r = pl.pallas_call(
        _mlp_kernel,
        out_shape=jax.ShapeDtypeStruct((rows, 2 * G), jnp.float32),
        grid=grid,
        in_specs=[
            pl.BlockSpec((rb, 3 * G), lambda i: (i, 0)),        # batch tile of xr
            resident(a1), resident(b1),
            resident(a2), resident(b2),
            resident(a3), resident(b3),
        ],
        out_specs=pl.BlockSpec((rb, 2 * G), lambda i: (i, 0)),  # lane-dense slab
        compiler_params=pltpu.CompilerParams(
            dimension_semantics=("parallel",),
            vmem_limit_bytes=48 * 1024 * 1024),
    )(xr, a1, b1, a2, b2, a3, b3)

    out = out_r.reshape(n_pad, 2)            # free row-major reshape back to [N, 2]
    return out[:n] if pad else out


def init_params(key):
    """Deterministic init matching nn.Linear (W: [out,in], b: [out,1])."""
    ks = jax.random.split(key, 6)

    def lin(kw, kb, fan_in, fan_out):
        bound = fan_in ** -0.5
        w = jax.random.uniform(kw, (fan_out, fan_in), jnp.float32, -bound, bound)
        b = jax.random.uniform(kb, (fan_out, 1), jnp.float32, -bound, bound)
        return w, b

    w1, b1 = lin(ks[0], ks[1], 3, 16)
    w2, b2 = lin(ks[2], ks[3], 16, 8)
    w3, b3 = lin(ks[4], ks[5], 8, 2)
    return {"w1": w1, "b1": b1, "w2": w2, "b2": b2, "w3": w3, "b3": b3}


def reference_forward(x, p):
    h1 = jnp.maximum(x @ p["w1"].T + p["b1"][:, 0], 0.0)
    h2 = jnp.maximum(h1 @ p["w2"].T + p["b2"][:, 0], 0.0)
    return h2 @ p["w3"].T + p["b3"][:, 0]


if __name__ == "__main__":
    key = jax.random.PRNGKey(0)
    k_x, k_p = jax.random.split(key)
    params = init_params(k_p)

    # Primary small case (a small batch of charge samples, as the module implies).
    # Extra sizes exercise the N % 8 pad path and a multi-step ragged grid.
    for n in (8, 1003, 10000):
        x = jax.random.normal(k_x, (n, 3), dtype=jnp.float32)
        out = jax.block_until_ready(chargenet_forward(x, params))
        with jax.default_matmul_precision("float32"):
            ref = reference_forward(x, params)
        assert out.shape == (n, 2)
        assert jnp.allclose(out, ref, atol=1e-3, rtol=1e-3)

    print("KERNEL_OK")
</pallas_src>

<mosaic_0001>
module attributes {stable_mosaic.version = 11 : i64} {
  func.func @_mlp_kernel(%arg0: i32, %arg1: memref<1x24xf32, #tpu.memory_space<vmem>>, %arg2: memref<24x128xf32, #tpu.memory_space<vmem>>, %arg3: memref<1x128xf32, #tpu.memory_space<vmem>>, %arg4: memref<128x64xf32, #tpu.memory_space<vmem>>, %arg5: memref<1x64xf32, #tpu.memory_space<vmem>>, %arg6: memref<64x16xf32, #tpu.memory_space<vmem>>, %arg7: memref<1x16xf32, #tpu.memory_space<vmem>>, %arg8: memref<1x16xf32, #tpu.memory_space<vmem>>) attributes {dimension_semantics = [#tpu.dimension_semantics<parallel>], iteration_bounds = array<i64: 1>, scalar_prefetch = 0 : i64, scratch_operands = 0 : i64, tpu.core_type = #tpu.core_type<tc>, window_params = [{transform_indices = @transform_0, window_bounds = array<i64: 1, 24>}, {pipeline_mode = #tpu.pipeline_mode<synchronous>, transform_indices = @transform_1, window_bounds = array<i64: 24, 128>}, {pipeline_mode = #tpu.pipeline_mode<synchronous>, transform_indices = @transform_2, window_bounds = array<i64: 1, 128>}, {pipeline_mode = #tpu.pipeline_mode<synchronous>, transform_indices = @transform_3, window_bounds = array<i64: 128, 64>}, {pipeline_mode = #tpu.pipeline_mode<synchronous>, transform_indices = @transform_4, window_bounds = array<i64: 1, 64>}, {pipeline_mode = #tpu.pipeline_mode<synchronous>, transform_indices = @transform_5, window_bounds = array<i64: 64, 16>}, {pipeline_mode = #tpu.pipeline_mode<synchronous>, transform_indices = @transform_6, window_bounds = array<i64: 1, 16>}, {transform_indices = @transform_7, window_bounds = array<i64: 1, 16>}]} {
    %c0 = arith.constant 0 : index
    %c0_0 = arith.constant 0 : index
    %0 = vector.load %arg1[%c0, %c0_0] : memref<1x24xf32, #tpu.memory_space<vmem>>, vector<1x24xf32>
    %c0_1 = arith.constant 0 : index
    %c0_2 = arith.constant 0 : index
    %1 = vector.load %arg2[%c0_1, %c0_2] : memref<24x128xf32, #tpu.memory_space<vmem>>, vector<24x128xf32>
    %cst = arith.constant dense<0.000000e+00> : vector<1x128xf32>
    %2 = tpu.matmul %0, %1, %cst {dimension_numbers = #tpu.dot_dimension_numbers<[1], [0], [0], [1], [0, 0, 1, 1], [], []>} : vector<1x24xf32>, vector<24x128xf32>, vector<1x128xf32> -> vector<1x128xf32>
    %c0_3 = arith.constant 0 : index
    %c0_4 = arith.constant 0 : index
    %3 = vector.load %arg3[%c0_3, %c0_4] : memref<1x128xf32, #tpu.memory_space<vmem>>, vector<1x128xf32>
    %4 = arith.addf %2, %3 : vector<1x128xf32>
    %cst_5 = arith.constant 0.000000e+00 : f32
    %5 = vector.broadcast %cst_5 : f32 to vector<1x128xf32>
    %6 = arith.maximumf %4, %5 : vector<1x128xf32>
    %c0_6 = arith.constant 0 : index
    %c0_7 = arith.constant 0 : index
    %7 = vector.load %arg4[%c0_6, %c0_7] : memref<128x64xf32, #tpu.memory_space<vmem>>, vector<128x64xf32>
    %cst_8 = arith.constant dense<0.000000e+00> : vector<1x64xf32>
    %8 = tpu.matmul %6, %7, %cst_8 {dimension_numbers = #tpu.dot_dimension_numbers<[1], [0], [0], [1], [0, 0, 1, 1], [], []>} : vector<1x128xf32>, vector<128x64xf32>, vector<1x64xf32> -> vector<1x64xf32>
    %c0_9 = arith.constant 0 : index
    %c0_10 = arith.constant 0 : index
    %9 = vector.load %arg5[%c0_9, %c0_10] : memref<1x64xf32, #tpu.memory_space<vmem>>, vector<1x64xf32>
    %10 = arith.addf %8, %9 : vector<1x64xf32>
    %cst_11 = arith.constant 0.000000e+00 : f32
    %11 = vector.broadcast %cst_11 : f32 to vector<1x64xf32>
    %12 = arith.maximumf %10, %11 : vector<1x64xf32>
    %c0_12 = arith.constant 0 : index
    %c0_13 = arith.constant 0 : index
    %13 = vector.load %arg6[%c0_12, %c0_13] : memref<64x16xf32, #tpu.memory_space<vmem>>, vector<64x16xf32>
    %cst_14 = arith.constant dense<0.000000e+00> : vector<1x16xf32>
    %14 = tpu.matmul %12, %13, %cst_14 {dimension_numbers = #tpu.dot_dimension_numbers<[1], [0], [0], [1], [0, 0, 1, 1], [], []>} : vector<1x64xf32>, vector<64x16xf32>, vector<1x16xf32> -> vector<1x16xf32>
    %c0_15 = arith.constant 0 : index
    %c0_16 = arith.constant 0 : index
    %15 = vector.load %arg7[%c0_15, %c0_16] : memref<1x16xf32, #tpu.memory_space<vmem>>, vector<1x16xf32>
    %16 = arith.addf %14, %15 : vector<1x16xf32>
    %c0_17 = arith.constant 0 : index
    %c0_18 = arith.constant 0 : index
    %17 = vector.load %arg8[%c0_17, %c0_18] : memref<1x16xf32, #tpu.memory_space<vmem>>, vector<1x16xf32>
    tpu.vector_store %arg8[%c0_17, %c0_18], %16 {strides = array<i32>} : memref<1x16xf32, #tpu.memory_space<vmem>>, vector<1x16xf32>,
    return
  }
  func.func @transform_0(%arg0: i32) -> (i32, i32) {
    %c0_i32 = arith.constant 0 : i32
    %c0_i32_0 = arith.constant 0 : i32
    return %arg0, %c0_i32 : i32, i32
  }
  func.func @transform_1(%arg0: i32) -> (i32, i32) {
    %c0_i32 = arith.constant 0 : i32
    %c0_i32_0 = arith.constant 0 : i32
    %c0_i32_1 = arith.constant 0 : i32
    return %c0_i32, %c0_i32_0 : i32, i32
  }
  func.func @transform_2(%arg0: i32) -> (i32, i32) {
    %c0_i32 = arith.constant 0 : i32
    %c0_i32_0 = arith.constant 0 : i32
    %c0_i32_1 = arith.constant 0 : i32
    return %c0_i32, %c0_i32_0 : i32, i32
  }
  func.func @transform_3(%arg0: i32) -> (i32, i32) {
    %c0_i32 = arith.constant 0 : i32
    %c0_i32_0 = arith.constant 0 : i32
    %c0_i32_1 = arith.constant 0 : i32
    return %c0_i32, %c0_i32_0 : i32, i32
  }
  func.func @transform_4(%arg0: i32) -> (i32, i32) {
    %c0_i32 = arith.constant 0 : i32
    %c0_i32_0 = arith.constant 0 : i32
    %c0_i32_1 = arith.constant 0 : i32
    return %c0_i32, %c0_i32_0 : i32, i32
  }
  func.func @transform_5(%arg0: i32) -> (i32, i32) {
    %c0_i32 = arith.constant 0 : i32
    %c0_i32_0 = arith.constant 0 : i32
    %c0_i32_1 = arith.constant 0 : i32
    return %c0_i32, %c0_i32_0 : i32, i32
  }
  func.func @transform_6(%arg0: i32) -> (i32, i32) {
    %c0_i32 = arith.constant 0 : i32
    %c0_i32_0 = arith.constant 0 : i32
    %c0_i32_1 = arith.constant 0 : i32
    return %c0_i32, %c0_i32_0 : i32, i32
  }
  func.func @transform_7(%arg0: i32) -> (i32, i32) {
    %c0_i32 = arith.constant 0 : i32
    %c0_i32_0 = arith.constant 0 : i32
    return %arg0, %c0_i32 : i32, i32
  }
}

</mosaic_0001>

<bundles_post_ra>
// kernel: tpu_custom_call.1
= control target key start
LH: loop header
LB: loop body
LE: loop exit
PB: predicated region body
PF: predicated region fallthrough
CT: control target
= control target key end

     0   :  { %v456_v2 = vmov 0.0|0.0   ;;  %vm457_vm0 = vmmov 0   ;;  %v458_v4 = vmov 0.0   ;;  %vm32_vm1 = vcmask 195584   ;;  %s621_s0 = inlined_call_operand.vmem [shape: f32[1,24], index: 0, kind: input, shape index: {}]   ;;  %s622_s1 = inlined_call_operand.vmem [shape: f32[24,128], index: 1, kind: input, shape index: {}]   ;;  %s623_s2 = inlined_call_operand.vmem [shape: f32[1,128], index: 2, kind: input, shape index: {}]   ;;  %s624_s3 = inlined_call_operand.vmem [shape: f32[128,64], index: 3, kind: input, shape index: {}]   ;;  %s625_s4 = inlined_call_operand.vmem [shape: f32[1,64], index: 4, kind: input, shape index: {}]   ;;  %s626_s5 = inlined_call_operand.vmem [shape: f32[64,16], index: 5, kind: input, shape index: {}]   ;;  %s627_s6 = inlined_call_operand.vmem [shape: f32[1,16], index: 6, kind: input, shape index: {}]   ;;  %s628_s7 = inlined_call_operand.hbm [shape: f32[1,16], index: 7, kind: output, shape index: {}]  }
   0x1   :  { %v28_v0 = vld [vmem:[%s622_s1] sm:$0xff]  ;;  %v29_v1 = vld [vmem:[%s622_s1 + $0x8] sm:$0xff]  ;;  %389 = vmatprep.subr.bf16.mxu0 %v456_v2  ;;  %332 = vmatprep.mubr.msk.f32.mxu0 %vm457_vm0, %v458_v4  ;;  %v109_v8 = vld [vmem:[%s624_s3 + $0x10] sm:$0xff] }
   0x2   :  { %v390_v3 = vpack.c.bf16 %v29_v1, %v28_v0  ;;  %v107_v5 = vld [vmem:[%s624_s3] sm:$0xff]  ;;  %v108_v6 = vld [vmem:[%s624_s3 + $0x8] sm:$0xff]  ;;  %392 = vmatprep.subr.bf16.mxu1 %v456_v2  ;;  %v110_v9 = vld [vmem:[%s624_s3 + $0x18] sm:$0xff]  ;;  %367 = vmatprep.mubr.msk.f32.mxu1 %vm457_vm0, %v458_v4 }
   0x3   :  { %v393_v7 = vpack.c.bf16 %v108_v6, %v107_v5  ;;  %v30_v10 = vld [vmem:[%s622_s1 + $0x10] sm:$0xff]  ;;  %v396_v11 = vpack.c.bf16 %v110_v9, %v109_v8  ;;  %v27_v12 = vld [vmem:[%s621_s0] sm:$0x1]  ;;  %v112_v14 = vld [vmem:[%s624_s3 + $0x28] sm:$0xff] }
   0x4   :  { %391 = vmatpush3.bf16.msra.mxu0 %v390_v3  ;;  %v111_v13 = vld [vmem:[%s624_s3 + $0x20] sm:$0xff] }
   0x5   :  { %330 = vmatprep.subr.mxu0 %v458_v4  ;;  %394 = vmatpush3.bf16.msra.mxu1 %v393_v7 }
   0x6   :  { %395 = vmatprep.subr.bf16.mxu1 %v456_v2 }
   0x7   :  { %12 = vsyncpa [#allocation3], 0  ;;  %v399_v15 = vpack.c.bf16 %v112_v14, %v111_v13  ;;  %v113_v16 = vld [vmem:[%s624_s3 + $0x30] sm:$0xff]  ;;  %v114_v17 = vld [vmem:[%s624_s3 + $0x38] sm:$0xff]  ;;  %vm204_vm2 = vcmask 523264   ;;  %s459_s11 = smov [#allocation2]  }
   0x8   :  { %331 = vmatpush3.msra.mxu0 %v30_v10  ;;  %v402_v18 = vpack.c.bf16 %v114_v17, %v113_v16  ;;  %v115_v19 = vld [vmem:[%s624_s3 + $0x40] sm:$0xff]  ;;  %v116_v20 = vld [vmem:[%s624_s3 + $0x48] sm:$0xff]  ;;  %v117_v22 = vld [vmem:[%s624_s3 + $0x50] sm:$0xff]  ;;  %s286_s12 = sshll.u32 %s459_s11, 4  ;;  %vm278_vm3 = vcmask 122880   ;;  %s287_s12 = int_to_ptr.vmem [resolvable:$true] %s286_s12 }
   0x9   :  { %333 = vmatmul.mubr.msk.f32.vlgmr.msra.gmra.mrb[0].mxu0 %vm32_vm1, %v27_v12  ;;  %397 = vmatpush3.bf16.msra.mxu1 %v396_v11  ;;  %v405_v21 = vpack.c.bf16 %v116_v20, %v115_v19  ;;  %v118_v23 = vld [vmem:[%s624_s3 + $0x58] sm:$0xff]  ;;  %v119_v25 = vld [vmem:[%s624_s3 + $0x60] sm:$0xff]  ;;  %v120_v26 = vld [vmem:[%s624_s3 + $0x68] sm:$0xff]  ;;  %p437_p1 = scmp.lt.s32.totalorder %s287_s12, %s287_s12 }
   0xa   :  { %398 = vmatprep.subr.bf16.mxu1 %v456_v2  ;;  %416 = vmatprep.subr.bf16.mxu0 %v456_v2  ;;  %v408_v24 = vpack.c.bf16 %v118_v23, %v117_v22  ;;  %v411_v27 = vpack.c.bf16 %v120_v26, %v119_v25  ;;  %v121_v28 = vld [vmem:[%s624_s3 + $0x70] sm:$0xff]  ;;  %v122_v29 = vld [vmem:[%s624_s3 + $0x78] sm:$0xff]  ;;  %v195_v31 = vld [vmem:[%s626_s5] sm:$0xff] }
   0xb   :  { %386 = vmatprep.mubr.msk.f32.mxu0 %vm457_vm0, %v458_v4  ;;  %v414_v30 = vpack.c.bf16 %v122_v29, %v121_v28  ;;  %v196_v32 = vld [vmem:[%s626_s5 + $0x8] sm:$0xff]  ;;  %v197_v33 = vld [vmem:[%s626_s5 + $0x10] sm:$0xff]  ;;  %v198_v35 = vld [vmem:[%s626_s5 + $0x18] sm:$0xff] }
   0xc   :  { %v417_v34 = vpack.c.bf16 %v196_v32, %v195_v31  ;;  %v420_v36 = vpack.c.bf16 %v198_v35, %v197_v33  ;;  %v199_v37 = vld [vmem:[%s626_s5 + $0x20] sm:$0xff]  ;;  %v200_v38 = vld [vmem:[%s626_s5 + $0x28] sm:$0xff]  ;;  %v201_v45 = vld [vmem:[%s626_s5 + $0x30] sm:$0xff] }
   0xd   :  { %400 = vmatpush3.bf16.msra.mxu1 %v399_v15  ;;  %v423_v39 = vpack.c.bf16 %v200_v38, %v199_v37  ;;  %v31_v40 = vld [vmem:[%s623_s2] sm:$0x1]  ;;  %v202_v46 = vld [vmem:[%s626_s5 + $0x38] sm:$0xff]  ;;  %s432_s5 = scalar_lea.vmem %s287_s12, 16 }
   0xe   :  { %401 = vmatprep.subr.bf16.mxu1 %v456_v2  ;;  %418 = vmatpush3.bf16.msra.mxu0 %v417_v34  ;;  %v426_v47 = vpack.c.bf16 %v202_v46, %v201_v45  ;;  %v123_v48 = vld [vmem:[%s625_s4] sm:$0x1]  ;;  %p433_p0 = scmp.ne.s32.totalorder %s287_s12, %s432_s5  ;;  %s436_s4 = scalar_lea.vmem %s287_s12, 32 }
   0xf   :  { %419 = vmatprep.subr.bf16.mxu0 %v456_v2  ;;  %v203_v53 = vld [vmem:[%s627_s6] sm:$0x1]  ;;  %p438_p2 = scmp.lt.s32.totalorder %s436_s4, %s432_s5 }
  0x11   :  { %403 = vmatpush3.bf16.msra.mxu1 %v402_v18  ;;  %p439_p3 = por %p438_p2, %p437_p1 }
  0x12   :  { %404 = vmatprep.subr.bf16.mxu1 %v456_v2  ;;  %421 = vmatpush3.bf16.msra.mxu0 %v420_v36 }
  0x13   :  { %422 = vmatprep.subr.bf16.mxu0 %v456_v2  ;;  %p440_p4 = pnand %p439_p3, %p433_p0 }
  0x15   :  { %406 = vmatpush3.bf16.msra.mxu1 %v405_v21 }
  0x16   :  { %407 = vmatprep.subr.bf16.mxu1 %v456_v2  ;;  %424 = vmatpush3.bf16.msra.mxu0 %v423_v39 }
  0x17   :  { %425 = vmatprep.subr.bf16.mxu0 %v456_v2 }
  0x19   :  { %409 = vmatpush3.bf16.msra.mxu1 %v408_v24 }
  0x1a   :  { %410 = vmatprep.subr.bf16.mxu1 %v456_v2  ;;  %427 = vmatpush3.bf16.msra.mxu0 %v426_v47 }
  0x1d   :  { %412 = vmatpush3.bf16.msra.mxu1 %v411_v27 }
  0x1e   :  { %413 = vmatprep.subr.bf16.mxu1 %v456_v2 }
  0x21   :  { %415 = vmatpush3.bf16.msra.mxu1 %v414_v30 }
  0xdc   :  { %v102_v41 = vpop.f32.mrb[0].mxu0 }
  0xdd   :  { %v103_v42 = vadd.f32 %v102_v41, %v31_v40  ;;  %v334_v43 = vpop.f32.mrb[1].mxu0 }
  0xdf   :  { %v106_v44 = vmax.f32 %v103_v42, 0.0 }
  0xe1   :  { %368 = vmatmul.mubr.f32.vlgmr.msra.gmra.mrb[0].mxu1 %v106_v44 }
 0x1b4   :  { %v190_v49 = vpop.f32.mrb[0].mxu1 }
 0x1b5   :  { %v191_v50 = vadd.f32 %v190_v49, %v123_v48  ;;  %v369_v51 = vpop.f32.mrb[1].mxu1 }
 0x1b7   :  { %v194_v52 = vmax.f32 %v191_v50, 0.0 }
 0x1b9   :  { %387 = vmatmul.mubr.msk.f32.vlgmr.msra.gmra.mrb[2].mxu0 %vm204_vm2, %v194_v52 }
 0x28c   :  { %v274_v54 = vpop.f32.mrb[2].mxu0 }
 0x28d   :  { %v275_v55 = vadd.f32 %v274_v54, %v203_v53  ;;  %v388_v56 = vpop.f32.mrb[3].mxu0 }
 0x28f   :  { %279 = vst.msk [vmem:[#allocation2] sm:$0x1] %vm278_vm3, %v275_v55 }
 0x290   :  { %443 = shalt.err (!%p440_p4)
}
 0x291   :  { %s444_s6 = scalar_lea.hbm %s628_s7, 16 }
 0x292   :  { %p445_p5 = scmp.ne.s32.totalorder %s628_s7, %s444_s6  ;;  %p448_p6 = scmp.lt.u32.totalorder %s444_s6, %s628_s7 }
 0x294   :  { %p450_p7 = pnand %p448_p6, %p445_p5 }
 0x296   :  { %453 = shalt.err (!%p450_p7)
}
 0x297   :  { %289 = dma.vmem_to_hbm [thread:$0]  %s287_s12, 16, %s628_s7, [#allocation3]  }
 0x298   :  { %454 = dma.done.wait [#allocation3], 16  }
 0x299   :  { %455 = vsyncadd [#allocation3], 4294967280 }
 0x29a   :  { %293 = vsyncpa [#allocation3], 1 }

</bundles_post_ra>
